<compile_context>
chip_gen: v5e
topology: v5e:2x2
jax: 0.10.0
libtpu: 0.0.40
codegen_flags: <defaults>
</compile_context>

<pallas_src>
import jax
import jax.numpy as jnp
from jax.experimental import pallas as pl
from jax.experimental.pallas import tpu as pltpu


def _round_up(x, m):
    return ((x + m - 1) // m) * m


def _sequence_loss_kernel(w_ref, pred_ref, gt_ref, mask_ref, out_ref, acc_ref):
    """One grid step = (hw tile t, prediction n).

    w_ref    : SMEM (N,)             gamma**(N-1-n) / (B*2*H*W)
    pred_ref : VMEM (1, B*2, T)      flow_preds[n], HW tile t (original dtype)
    gt_ref   : VMEM (B*2, T)         flow_gt, HW tile t (f32, resident over N)
    mask_ref : VMEM (B*2, T)         fused validity mask (f32 0/1, resident)
    out_ref  : VMEM (1, 8, 128)      per-HW-tile partial sum (broadcast fill)
    acc_ref  : VMEM (B*2, T) f32     scratch accumulator over N
    """
    n = pl.program_id(1)
    n_last = pl.num_programs(1) - 1

    @pl.when(n == 0)
    def _():
        acc_ref[...] = jnp.zeros_like(acc_ref)

    pred = pred_ref[0].astype(jnp.float32)                    # (B*2, T)
    # Weighted L1 accumulation; mask is applied once at the end (mask is 0/1,
    # so mask * sum_n w_n*|d_n| == sum_n w_n*mask*|d_n| exactly).
    acc_ref[...] += w_ref[n] * jnp.abs(pred - gt_ref[...])

    @pl.when(n == n_last)
    def _():
        partial = jnp.sum(mask_ref[...] * acc_ref[...])       # one reduce / tile
        out_ref[...] = jnp.full(out_ref.shape, partial, dtype=out_ref.dtype)


def sequence_loss_pallas(flow_preds, flow_gt, valid, *, gamma, max_flow,
                         tile_hw=8192):
    """flow_preds: (N, B, 2, H, W); flow_gt: (B, 2, H, W); valid: (B, 1, H, W)."""
    n, b, c, h, w = flow_preds.shape
    assert c == 2
    hw = h * w
    r = b * c
    denom = float(r * hw)   # mean over B*2*H*W elements (matches torch .mean())

    # Fused validity mask, computed once in XLA. No sqrt: compare squared mag.
    gt_f32 = flow_gt.astype(jnp.float32)
    mag_sq = jnp.sum(gt_f32 * gt_f32, axis=1, keepdims=True)          # (B,1,H,W)
    mask = jnp.logical_and(valid.astype(jnp.float32) >= 0.5,
                           mag_sq < float(max_flow) ** 2)             # (B,1,H,W)
    mask = jnp.broadcast_to(mask, (b, c, h, w)).reshape(r, hw)
    mask = mask.astype(jnp.float32)

    # Dense (rows, lanes) layout; keep preds in their original dtype (bf16 ok).
    preds = flow_preds.reshape(n, r, hw)
    gt = gt_f32.reshape(r, hw)

    # Lane-dense HW tiling; pad the tail with zeros (mask=0 => contributes 0).
    tile = min(int(tile_hw), _round_up(hw, 128))
    hw_pad = _round_up(hw, tile)
    if hw_pad != hw:
        pad = hw_pad - hw
        preds = jnp.pad(preds, ((0, 0), (0, 0), (0, pad)))
        gt = jnp.pad(gt, ((0, 0), (0, pad)))
        mask = jnp.pad(mask, ((0, 0), (0, pad)))
    num_tiles = hw_pad // tile

    # Fold 1/denom into the per-prediction weights.
    weights = jnp.asarray([gamma ** (n - i - 1) / denom for i in range(n)],
                          dtype=jnp.float32)

    grid_spec = pltpu.PrefetchScalarGridSpec(
        num_scalar_prefetch=0,
        grid=(num_tiles, n),                                   # N innermost
        in_specs=[
            pl.BlockSpec(memory_space=pltpu.MemorySpace.SMEM),           # weights
            pl.BlockSpec((1, r, tile), lambda t, i: (i, 0, t)),          # preds[i]
            pl.BlockSpec((r, tile), lambda t, i: (0, t)),                # gt
            pl.BlockSpec((r, tile), lambda t, i: (0, t)),                # mask
        ],
        out_specs=pl.BlockSpec((1, 8, 128), lambda t, i: (t, 0, 0)),     # partials
        scratch_shapes=[pltpu.VMEM((r, tile), jnp.float32)],             # acc
    )

    partials = pl.pallas_call(
        _sequence_loss_kernel,
        out_shape=jax.ShapeDtypeStruct((num_tiles, 8, 128), jnp.float32),
        grid_spec=grid_spec,
        compiler_params=pltpu.CompilerParams(
            dimension_semantics=("parallel", "arbitrary")),
    )(weights, preds, gt, mask)

    return jnp.sum(partials[:, 0, 0])


def sequence_loss_ref(flow_preds, flow_gt, valid, *, gamma, max_flow):
    """Pure-JAX reference mirroring the PyTorch module."""
    n = flow_preds.shape[0]
    mag = jnp.sqrt(jnp.sum(flow_gt ** 2, axis=1, keepdims=True))
    v = jnp.logical_and(valid >= 0.5, mag < max_flow)
    loss = 0.0
    for i in range(n):
        w = gamma ** (n - i - 1)
        i_loss = jnp.abs(flow_preds[i] - flow_gt)
        loss += w * jnp.mean(v.astype(jnp.float32) * i_loss)
    return loss


if __name__ == "__main__":
    # Deterministic "parameters" of the module.
    gamma = 0.8
    max_flow = 400.0

    # Small synthetic shapes consistent with the forward pass.
    N_PRED, B, H, W = 4, 2, 16, 16

    key = jax.random.PRNGKey(0)
    k1, k2, k3 = jax.random.split(key, 3)

    # outputs['flow_preds']: list of N_PRED tensors (B, 2, H, W) -> stacked.
    flow_preds = 10.0 * jax.random.normal(k1, (N_PRED, B, 2, H, W), jnp.float32)
    # inputs['flows']: (B, 1, 2, H, W); take [:, 0]
    flows = 10.0 * jax.random.normal(k2, (B, 1, 2, H, W), jnp.float32)
    # inputs['valids']: (B, 1, 1, H, W); take [:, 0]
    valids = jax.random.uniform(k3, (B, 1, 1, H, W), jnp.float32)

    flow_gt = flows[:, 0]
    valid = valids[:, 0]

    loss = sequence_loss_pallas(flow_preds, flow_gt, valid,
                                gamma=gamma, max_flow=max_flow)
    loss = jax.block_until_ready(loss)

    ref = sequence_loss_ref(flow_preds, flow_gt, valid,
                            gamma=gamma, max_flow=max_flow)
    assert jnp.allclose(loss, ref, rtol=1e-4, atol=1e-5), (loss, ref)

    print("KERNEL_OK")
</pallas_src>

<mosaic_0001>
module attributes {stable_mosaic.version = 11 : i64} {
  func.func @_sequence_loss_kernel(%arg0: i32, %arg1: i32, %arg2: memref<4xf32, #tpu.memory_space<smem>>, %arg3: memref<1x4x256xf32, #tpu.memory_space<vmem>>, %arg4: memref<4x256xf32, #tpu.memory_space<vmem>>, %arg5: memref<4x256xf32, #tpu.memory_space<vmem>>, %arg6: memref<1x8x128xf32, #tpu.memory_space<vmem>>, %arg7: memref<4x256xf32, #tpu.memory_space<vmem>>) attributes {dimension_semantics = [#tpu.dimension_semantics<parallel>, #tpu.dimension_semantics<arbitrary>], iteration_bounds = array<i64: 1, 4>, scalar_prefetch = 0 : i64, scratch_operands = 1 : i64, tpu.core_type = #tpu.core_type<tc>, window_params = [{transform_indices = @transform_0, window_bounds = array<i64: 4>}, {transform_indices = @transform_1, window_bounds = array<i64: 1, 4, 256>}, {transform_indices = @transform_2, window_bounds = array<i64: 4, 256>}, {transform_indices = @transform_3, window_bounds = array<i64: 4, 256>}, {transform_indices = @transform_4, window_bounds = array<i64: 1, 8, 128>}]} {
    %c0_i32 = arith.constant 0 : i32
    %0 = arith.cmpi eq, %arg1, %c0_i32 : i32
    %1 = arith.extui %0 : i1 to i32
    %c0_i32_0 = arith.constant 0 : i32
    %2 = arith.cmpi ne, %1, %c0_i32_0 : i32
    scf.if %2 {
      %cst = arith.constant 0.000000e+00 : f32
      %18 = vector.broadcast %cst : f32 to vector<4x256xf32>
      %c0_10 = arith.constant 0 : index
      %c0_11 = arith.constant 0 : index
      %19 = vector.load %arg7[%c0_10, %c0_11] : memref<4x256xf32, #tpu.memory_space<vmem>>, vector<4x256xf32>
      tpu.vector_store %arg7[%c0_10, %c0_11], %18 {strides = array<i32>} : memref<4x256xf32, #tpu.memory_space<vmem>>, vector<4x256xf32>,
    } else {
    }
    %c0 = arith.constant 0 : index
    %c0_1 = arith.constant 0 : index
    %c0_2 = arith.constant 0 : index
    %3 = vector.load %arg3[%c0, %c0_1, %c0_2] : memref<1x4x256xf32, #tpu.memory_space<vmem>>, vector<1x4x256xf32>
    %4 = vector.shape_cast %3 : vector<1x4x256xf32> to vector<4x256xf32>
    %c0_3 = arith.constant 0 : index
    %c0_4 = arith.constant 0 : index
    %5 = vector.load %arg7[%c0_3, %c0_4] : memref<4x256xf32, #tpu.memory_space<vmem>>, vector<4x256xf32>
    %6 = arith.index_cast %arg1 : i32 to index
    %7 = memref.load %arg2[%6] : memref<4xf32, #tpu.memory_space<smem>>
    %c0_5 = arith.constant 0 : index
    %c0_6 = arith.constant 0 : index
    %8 = vector.load %arg4[%c0_5, %c0_6] : memref<4x256xf32, #tpu.memory_space<vmem>>, vector<4x256xf32>
    %9 = arith.subf %4, %8 : vector<4x256xf32>
    %10 = math.absf %9 : vector<4x256xf32>
    %11 = vector.broadcast %7 : f32 to vector<4x256xf32>
    %12 = arith.mulf %11, %10 : vector<4x256xf32>
    %13 = arith.addf %5, %12 : vector<4x256xf32>
    %c0_7 = arith.constant 0 : index
    %c0_8 = arith.constant 0 : index
    %14 = vector.load %arg7[%c0_7, %c0_8] : memref<4x256xf32, #tpu.memory_space<vmem>>, vector<4x256xf32>
    tpu.vector_store %arg7[%c0_7, %c0_8], %13 {strides = array<i32>} : memref<4x256xf32, #tpu.memory_space<vmem>>, vector<4x256xf32>,
    %c3_i32 = arith.constant 3 : i32
    %15 = arith.cmpi eq, %arg1, %c3_i32 : i32
    %16 = arith.extui %15 : i1 to i32
    %c0_i32_9 = arith.constant 0 : i32
    %17 = arith.cmpi ne, %16, %c0_i32_9 : i32
    scf.if %17 {
      %c0_10 = arith.constant 0 : index
      %c0_11 = arith.constant 0 : index
      %18 = vector.load %arg5[%c0_10, %c0_11] : memref<4x256xf32, #tpu.memory_space<vmem>>, vector<4x256xf32>
      %c0_12 = arith.constant 0 : index
      %c0_13 = arith.constant 0 : index
      %19 = vector.load %arg7[%c0_12, %c0_13] : memref<4x256xf32, #tpu.memory_space<vmem>>, vector<4x256xf32>
      %20 = arith.mulf %18, %19 : vector<4x256xf32>
      %21 = vector.shape_cast %20 : vector<4x256xf32> to vector<1x4x256xf32>
      %cst = arith.constant dense<0.000000e+00> : vector<1xf32>
      %22 = vector.multi_reduction <add>, %21, %cst [1, 2] : vector<1x4x256xf32> to vector<1xf32>
      %23 = vector.shape_cast %22 : vector<1xf32> to vector<1x1x1xf32>
      %24 = vector.extract %23[0, 0, 0] : f32 from vector<1x1x1xf32>
      %25 = vector.broadcast %24 : f32 to vector<1x8x128xf32>
      %c0_14 = arith.constant 0 : index
      %c0_15 = arith.constant 0 : index
      %c0_16 = arith.constant 0 : index
      %26 = vector.load %arg6[%c0_14, %c0_15, %c0_16] : memref<1x8x128xf32, #tpu.memory_space<vmem>>, vector<1x8x128xf32>
      tpu.vector_store %arg6[%c0_14, %c0_15, %c0_16], %25 {strides = array<i32>} : memref<1x8x128xf32, #tpu.memory_space<vmem>>, vector<1x8x128xf32>,
    } else {
    }
    return
  }
  func.func @transform_0(%arg0: i32, %arg1: i32) -> i32 {
    %c0_i32 = arith.constant 0 : i32
    %c0_i32_0 = arith.constant 0 : i32
    return %c0_i32 : i32
  }
  func.func @transform_1(%arg0: i32, %arg1: i32) -> (i32, i32, i32) {
    %c0_i32 = arith.constant 0 : i32
    %c0_i32_0 = arith.constant 0 : i32
    return %arg1, %c0_i32, %arg0 : i32, i32, i32
  }
  func.func @transform_2(%arg0: i32, %arg1: i32) -> (i32, i32) {
    %c0_i32 = arith.constant 0 : i32
    %c0_i32_0 = arith.constant 0 : i32
    return %c0_i32, %arg0 : i32, i32
  }
  func.func @transform_3(%arg0: i32, %arg1: i32) -> (i32, i32) {
    %c0_i32 = arith.constant 0 : i32
    %c0_i32_0 = arith.constant 0 : i32
    return %c0_i32, %arg0 : i32, i32
  }
  func.func @transform_4(%arg0: i32, %arg1: i32) -> (i32, i32, i32) {
    %c0_i32 = arith.constant 0 : i32
    %c0_i32_0 = arith.constant 0 : i32
    %c0_i32_1 = arith.constant 0 : i32
    return %arg0, %c0_i32, %c0_i32_0 : i32, i32, i32
  }
}

</mosaic_0001>

<bundles_post_ra>
// kernel: tpu_custom_call.1
= control target key start
LH: loop header
LB: loop body
LE: loop exit
PB: predicated region body
PF: predicated region fallthrough
CT: control target
= control target key end

     0   :  { %9 = vsyncpa [#allocation6], 0  ;;  %s906_s0 = inlined_call_operand.hbm [shape: f32[4], index: 0, kind: input, shape index: {}]   ;;  %s907_s1 = inlined_call_operand.hbm [shape: f32[4,4,256], index: 1, kind: input, shape index: {}]   ;;  %s908_s2 = inlined_call_operand.hbm [shape: f32[4,256], index: 2, kind: input, shape index: {}]   ;;  %s909_s3 = inlined_call_operand.hbm [shape: f32[4,256], index: 3, kind: input, shape index: {}]   ;;  %s910_s4 = inlined_call_operand.hbm [shape: f32[1,8,128], index: 4, kind: output, shape index: {}]  }
   0x1   :  { %10 = vsyncpa [#allocation4], 0 }
   0x2   :  { %12 = vsyncpa [#allocation4 + $0x1], 0 }
   0x3   :  { %13 = vsyncpa [#allocation9], 0 }
   0x4   :  { %14 = vsyncpa [#allocation5], 0  ;;  %s784_s15 = smov 0   ;;  %s786_s16 = smov 0  }
   0x5   :  { %s788_s17 = smov 0   ;;  %s790_s18 = smov 0  }
   0x6   :  { %s792_s19 = smov 0   ;;  %s794_s20 = smov 0  }
   0x7 LB: > { %s440_s21 = sadd.s32 4294967295, %s752_s20   ;;  %p75_p0 = scmp.ne.s32.totalorder %s736_s16, %s732_s15  ;;  %s752_s20 = sphi %s794_s20, %s20_s20   ;;  %s748_s19 = sphi %s792_s19, %s918_s19   ;;  %s744_s18 = sphi %s790_s18, %s917_s18   ;;  %s740_s17 = sphi %s788_s17, %s916_s17   ;;  %s736_s16 = sphi %s786_s16, %s915_s16   ;;  %s732_s15 = sphi %s784_s15, %s914_s15  }
   0x8   : > { %p816_p1 = scmp.eq.s32.totalorder %s440_s21, 0  ;;  %p441_p2 = scmp.ge.s32.totalorder %s752_s20, 1 }
   0x9   : > { %p164_p3 = scmp.lt.s32.totalorder %s752_s20, 5  ;;  %s189_s26 = sshll.u32 %s908_s2, 4  ;;  %s190_s26 = int_to_ptr.hbm [resolvable:$true] %s189_s26 }
   0xa   : > { %p824_p4 = por %p816_p1, %p75_p0  ;;  %s754_s28 = smov [#allocation8]  }
   0xb   : > { %p831_p5 = pnand %p441_p2, %p164_p3  ;;  %s191_s29 = sshll.u32 %s754_s28, 4  ;;  %s192_s29 = int_to_ptr.vmem [resolvable:$true] %s191_s29 }
   0xc   : > { %s176_s6 = sshll.u32 %s906_s0, 4  ;;  %s755_s7 = smov [#allocation3]   ;;  %s177_s6 = int_to_ptr.hbm [resolvable:$true] %s176_s6 }
   0xd   : > { %p481_p6 = pneg %p831_p5  ;;  %s204_s10 = sshll.u32 %s909_s3, 4  ;;  %s205_s10 = int_to_ptr.hbm [resolvable:$true] %s204_s10 }
   0xe   : > { %s756_s11 = smov [#allocation10]   ;;  %s62_s13 = sadd.s32 1, %s740_s17 }
   0xf   : > { %p482_p7 = pnand %p481_p6, %p816_p1  ;;  %s206_s12 = sshll.u32 %s756_s11, 4  ;;  %s207_s12 = int_to_ptr.vmem [resolvable:$true] %s206_s12 }
  0x10   : > { %s29_s14 = sadd.s32 1, %s748_s19  ;;  %p69_p8 = scmp.ne.s32.totalorder %s740_s17, %s736_s16 }
  0x11   : > { %487 = dma.hbm_to_vmem [thread:$0]  (!%p482_p7), %s190_s26, 128, %s192_s29, [#allocation9]  }
  0x12   : > { %484 = dma.hbm_to_smem (!%p482_p7), %s177_s6, 16, %s755_s7, [#allocation6]  }
  0x13   : > { %490 = dma.hbm_to_vmem [thread:$0]  (!%p482_p7), %s205_s10, 128, %s207_s12, [#allocation9]  }
  0x14   : > { %p30_p9 = scmp.ge.s32.totalorder %s29_s14, 4  ;;  %p70_p10 = scmp.eq.s32.totalorder %s752_s20, 0 }
  0x15   : > { %p498_p11 = scmp.lt.s32.totalorder %s752_s20, 4  ;;  %s217_s15 = sand.u32 1, %s740_s17  }
  0x16   : > { %s920_s14 = smov (%p30_p9, %s29_s14), 0  ;;  %p71_p12 = por %p70_p10, %p69_p8 }
  0x17   : > { %s57_s24 = ssub.s32 %s748_s19, %s920_s14  ;;  %s446_s25 = sshll.u32 %s217_s15, 3 }
  0x18   : > { %p60_p13 = scmp.eq.s32.totalorder %s57_s24, 0  ;;  %s460_s26 = sshll.u32 %s748_s19, 3 }
  0x19   : > { %s221_s28 = scalar_lea.vmem [#allocation7], %s446_s25  ;;  %s228_s7 = scalar_lea.hbm %s907_s1, %s460_s26 }
  0x1a   : > { %s232_s29 = sshll.u32 %s221_s28, 4  ;;  %s230_s8 = sshll.u32 %s228_s7, 4  ;;  %s233_s29 = int_to_ptr.vmem [resolvable:$true] %s232_s29  ;;  %s231_s8 = int_to_ptr.hbm [resolvable:$true] %s230_s8 }
  0x1b   : > { %s858_s30 = scalar_select %p60_p13, %s740_s17, %s62_s13  }
  0x1c   : > { %p492_p0 = pnand %p498_p11, %p71_p12  ;;  %s218_s9 = scalar_lea.sflag [#allocation4], %s217_s15 }
  0x1d   : > { %241 = sbr.rel (%p831_p5) target bundleno = 270 (0x10e), region = 36 }
  0x1e   : > { %494 = dma.hbm_to_vmem [thread:$0]  (!%p492_p0), %s231_s8, 128, %s233_s29, %s218_s9  }
  0x22   : > { %715 = dma.done.wait (%p816_p1), [#allocation6], 16  }
  0x23   : > { %717 = vsyncadd (%p816_p1), [#allocation6], 4294967280  ;;  %s248_s10 = sand.u32 1, %s736_s16  }
  0x24   : > { %s451_s11 = sshll.u32 %s248_s10, 3  ;;  %s249_s12 = scalar_lea.sflag [#allocation4], %s248_s10 }
  0x25   : > { %s252_s13 = scalar_lea.vmem [#allocation7], %s451_s11 }
  0x26   : > { %719 = dma.done.wait (%p824_p4), %s249_s12, 128  }
  0x27   : > { %721 = vsyncadd (%p824_p4), %s249_s12, 4294967168 }
  0x28   : > { %723 = dma.done.wait (%p816_p1), [#allocation9], 256  }
  0x29   : > { %725 = vsyncadd (%p816_p1), [#allocation9], 4294967040 }
  0x2a   : > { %268 = sfence }
  0x2b   : > { %p454_p2 = scmp.ne.s32.totalorder %s744_s18, 0 }
  0x2d   : > { %290 = sbr.rel (%p454_p2) target bundleno = 52 (0x34), region = 56 }
  0x32   : > { %v757_v0 = vmov 0.0  }
  0x33   : > { %291 = vst [vmem:[#allocation2] sm:$0xff] %v757_v0 }
  0x34 PF: > { %v292_v1 = vld [vmem:[%s252_s13] sm:$0xff]  ;;  %s294_s27 = sld [smem:[#allocation3 + %s744_s18]]  ;;  %v295_v2 = vld [vmem:[#allocation8] sm:$0xff]  ;;  %p455_p1 = scmp.ne.s32.totalorder %s744_s18, 3 }
  0x35   : > { %v296_v3 = vsub.f32 %v292_v1, %v295_v2 }
  0x37   : > { %v297_v4 = vand.u32 2147483647, %v296_v3 }
  0x3a   : > { %v293_v5 = vld [vmem:[#allocation2] sm:$0xff]  ;;  %v298_v6 = vstv %s294_s27 }
  0x3b   : > { %v299_v7 = vmul.f32 %v298_v6, %v297_v4  ;;  %305 = sbr.rel (%p455_p1) target bundleno = 264 (0x108), region = 60 }
  0x3d   : > { %v300_v8 = vadd.f32 %v299_v7, %v293_v5 }
  0x3f   : > { %301 = vst [vmem:[#allocation2] sm:$0xff] %v300_v8 }
  0x40   : > { %v306_v9 = vld [vmem:[#allocation10] sm:$0xff]  ;;  %vm315_vm0 = vcmask 1043456  }
  0x46   : > { %v307_v10 = vld [vmem:[#allocation2] sm:$0xff] }
  0x47   : > { %v308_v11 = vmul.f32 %v307_v10, %v306_v9 }
  0x49   : > { %310 = vst [vmem:[#allocation1] ss:$2 sm:$0xff] %v308_v11 }
  0x50   : > { %v311_v12 = vld.sshfl [vmem:[#allocation1] sm:$0xff pattern:$0x75316420]  ;;  %v312_v13 = vld.sshfl [vmem:[#allocation1 + $0x8] sm:$0xff pattern:$0x75316420] }
  0x51   : > { %v316_v14 = vsel %vm315_vm0, %v311_v12, 0.0  ;;  %v317_v15 = vsel %vm315_vm0, %v312_v13, 0.0 }
  0x52   : > { %v318_v16 = vadd.f32 %v317_v15, %v316_v14 }
  0x54   : > { %319 = vadd.xlane.f32.xlu0 %v318_v16 }
  0xc7   : > { %v320_v17 = vpop.xlane.xlu0 %319 }
  0xc8   : > { %v321_v18 = vrot.slane %v320_v17, 4 }
  0xca   : > { %v322_v19 = vadd.f32 %v321_v18, %v320_v17 }
  0xcc   : > { %v323_v20 = vrot.slane %v322_v19, 2 }
  0xce   : > { %v324_v21 = vadd.f32 %v323_v20, %v322_v19 }
  0xd0   : > { %v325_v22 = vrot.slane %v324_v21, 1 }
  0xd2   : > { %v326_v23 = vadd.f32 %v325_v22, %v324_v21 }
  0xd4   : > { %461 = vpush %v326_v23 }
 0x105   : > { %s462_s18 = spop %461 }
 0x106   : > { %v328_v24 = vstv %s462_s18 }
 0x107   : > { %329 = vst [vmem:[#allocation11] sm:$0xff] %v328_v24 }
 0x108 PF: > { %p502_p3 = scmp.eq.s32.totalorder %s440_s21, 3  ;;  %s340_s15 = sshll.u32 %s910_s4, 4  ;;  %s341_s15 = int_to_ptr.hbm [resolvable:$true] %s340_s15 }
 0x109   : > { %s758_s24 = smov [#allocation11]  }
 0x10a   : > { %s338_s25 = sshll.u32 %s758_s24, 4  ;;  %s339_s25 = int_to_ptr.vmem [resolvable:$true] %s338_s25 }
 0x10b   : > { %478 = dma.vmem_to_hbm [thread:$0]  (%p502_p3), %s339_s25, 128, %s341_s15, [#allocation5]  }
 0x10c   : > { %727 = dma.done.wait (%p502_p3), [#allocation5], 128  }
 0x10d   : > { %729 = vsyncadd (%p502_p3), [#allocation5], 4294967168 }
 0x10e PF: > { %s20_s20 = sadd.s32 1, %s752_s20   ;;  %s914_s15 = smov %s736_s16 }
 0x10f   : > { %p17_p4 = scmp.ge.s32.totalorder %s20_s20, 6   ;;  %s915_s16 = smov %s740_s17 }
 0x110   : > { %s916_s17 = smov %s858_s30  ;;  %s917_s18 = smov %s748_s19 }
 0x111   : > { %s918_s19 = smov %s920_s14  ;;  %19 = sbr.rel (!%p17_p4) target bundleno = 7 (0x7), region = 97 }
 0x116   :  { %354 = vsyncpa [#allocation4], 1 }
 0x117   :  { %356 = vsyncpa [#allocation4 + $0x1], 1 }
 0x118   :  { %357 = vsyncpa [#allocation9], 1 }
 0x119   :  { %358 = vsyncpa [#allocation5], 1 }
 0x11a   :  { %360 = vsyncpa [#allocation5 + $0x1], 1 }
 0x11b   :  { %361 = vsyncpa [#allocation6], 1 }
 0x11c   :  { %363 = vsyncpa [#allocation6 + $0x1], 1 }

</bundles_post_ra>
